<compile_context>
chip_gen: v7x
topology: tpu7x:2x2x1
jax: 0.10.0
libtpu: 0.0.40
codegen_flags: <defaults>
</compile_context>

<pallas_src>
import functools

import jax
import jax.numpy as jnp
from jax.experimental import pallas as pl
from jax.experimental.pallas import tpu as pltpu


# ---------------------------------------------------------------------------
# kernels
# ---------------------------------------------------------------------------
def _ce_tile_loss(logits_ref, target_ref, mask_ref, *, pos_weight, seq_len,
                  seq_tile, needs_seq_mask):
    """Weighted / masked CE loss for one (tb, ts, C) tile -> (tb, ts, 1) f32."""
    x = logits_ref[...]                               # (tb, ts, C) native dtype
    tgt = target_ref[...].astype(jnp.int32)           # (tb, ts, 1)

    # Numerically stable fused form: loss = log(sum_c exp(x_c - m)) - (x[tgt] - m)
    m = jnp.max(x, axis=-1, keepdims=True)             # (tb, ts, 1) native dtype
    xm = x - m                                         # (tb, ts, C) native, <= 0
    sum_exp = jnp.sum(jnp.exp(xm.astype(jnp.float32)), axis=-1, keepdims=True)
    lse = jnp.log(sum_exp)                             # (tb, ts, 1) f32

    # Target gather: one-hot select against a (1,1,C) iota (broadcast compare),
    # reusing the already-computed (x - m).
    cls = jax.lax.broadcasted_iota(jnp.int32, (1, 1, x.shape[-1]), 2)
    tgt_xm = jnp.sum(jnp.where(cls == tgt, xm, 0),
                     axis=-1, keepdims=True).astype(jnp.float32)

    loss = lse - tgt_xm                                # (tb, ts, 1) f32

    # pos_weight applied where target > 0 (exactly the PyTorch module's
    # weighting; the module has no ignore_index so none is implemented).
    loss = loss * jnp.where(tgt > 0, jnp.float32(pos_weight), jnp.float32(1.0))
    if mask_ref is not None:
        loss = loss * mask_ref[...].astype(jnp.float32)

    if needs_seq_mask:
        # cdiv grid on seq: zero the garbage rows of the partial tail tile.
        row = (pl.program_id(1) * seq_tile
               + jax.lax.broadcasted_iota(jnp.int32, loss.shape, 1))
        loss = jnp.where(row < seq_len, loss, jnp.float32(0.0))
    return loss


def _ce_reduce_kernel(*refs, pos_weight, seq_len, seq_tile, needs_seq_mask,
                      has_mask):
    if has_mask:
        logits_ref, target_ref, mask_ref, out_ref, acc_ref = refs
    else:
        logits_ref, target_ref, out_ref, acc_ref = refs
        mask_ref = None

    loss = _ce_tile_loss(logits_ref, target_ref, mask_ref,
                         pos_weight=pos_weight, seq_len=seq_len,
                         seq_tile=seq_tile, needs_seq_mask=needs_seq_mask)

    # f32 VMEM scratch accumulator; the resident (tb,1,1) output block is
    # written exactly once, at the last seq step.
    @pl.when(pl.program_id(1) == 0)
    def _():
        acc_ref[...] = jnp.zeros_like(acc_ref)

    acc_ref[...] += jnp.sum(loss, axis=1, keepdims=True)       # (tb, 1, 1)

    @pl.when(pl.program_id(1) == pl.num_programs(1) - 1)
    def _():
        out_ref[...] = acc_ref[...]


def _ce_noreduce_kernel(*refs, pos_weight, seq_len, seq_tile, needs_seq_mask,
                        has_mask):
    if has_mask:
        logits_ref, target_ref, mask_ref, out_ref = refs
    else:
        logits_ref, target_ref, out_ref = refs
        mask_ref = None

    loss = _ce_tile_loss(logits_ref, target_ref, mask_ref,
                         pos_weight=pos_weight, seq_len=seq_len,
                         seq_tile=seq_tile, needs_seq_mask=needs_seq_mask)
    out_ref[...] = loss.astype(out_ref.dtype)


# ---------------------------------------------------------------------------
# tile / VMEM sizing
# ---------------------------------------------------------------------------
def _vmem_limit_bytes():
    """Scoped-VMEM limit per generation (v5e/v6e: 128 MiB physical, v7x: 64),
    leaving headroom for Mosaic-internal scratch."""
    cap = 64 * 1024 * 1024                    # conservative default (v7x)
    try:
        info = pltpu.get_tpu_info()
        cap = int(getattr(info, "vmem_capacity_bytes", cap))
    except Exception:
        pass
    return int(min(cap * 3 // 4, 96 * 1024 * 1024))


def _choose_tiles(B, S, C, itemsize, vmem_limit):
    """Pick (tb, ts).  tb only needs to divide B; ts needs 8-sublane alignment
    (or the full axis).  The budget accounts for the double-buffered logits
    stream, native + f32 in-kernel temporaries and the lane-padded per-row
    scalars, so both big-vocab and small-vocab shapes fit without spills."""
    bytes_per_row = (
        2 * C * itemsize      # logits tile, double-buffered by the pipeline
        + 2 * C * itemsize    # native-dtype temporaries (x - m, one-hot select)
        + 2 * C * 4           # f32 exp-path temporaries
        + 6 * 1024            # lane-padded (.., 1) per-row scalars
    )
    rows = max(8, (vmem_limit * 3 // 5) // bytes_per_row)

    # Batch tile: widen only when a whole (1, S, C) slab underuses the budget;
    # cap at B // 2 so the reduce path keeps >= 2 steps on its parallel axis
    # (v7x megacore).  Worst case tb = 1 (always divides B).
    tb = max(1, min(B, rows // max(1, S)))
    if B >= 2:
        tb = max(1, min(tb, B // 2))
    while B % tb:
        tb -= 1

    rows_per_batch = max(8, rows // tb)
    if S <= rows_per_batch:
        ts = S                                     # full-axis escape clause
    else:
        ts = rows_per_batch // 8 * 8
        for cand in range(ts, max(8, ts // 2) - 1, -8):   # prefer exact divisor
            if S % cand == 0:
                ts = cand
                break
    return tb, ts


# ---------------------------------------------------------------------------
# wrapper
# ---------------------------------------------------------------------------
def cross_entropy_loss(logits, target, mask=None, *, pos_weight=1.0,
                       reduce=True, tile_override=None):
    """Pallas TPU implementation of the PyTorch CrossEntropyLoss module.

    logits: float [batch, seq_len, num_classes]   (streamed in native dtype)
    target: int   [batch, seq_len]
    mask:   int   [batch, seq_len] or None
    """
    B, S, C = logits.shape
    has_mask = mask is not None

    # target / mask are carried as (B, S, 1): their blocks then only constrain
    # the seq tile to 8-sublane alignment, decoupling tiling from num_classes.
    inputs = [logits, target.astype(jnp.int32).reshape(B, S, 1)]
    if has_mask:
        inputs.append(mask.astype(jnp.int32).reshape(B, S, 1))

    itemsize = jnp.dtype(logits.dtype).itemsize
    vmem_limit = _vmem_limit_bytes()
    tb, ts = (tile_override if tile_override is not None
              else _choose_tiles(B, S, C, itemsize, vmem_limit))
    nb, ns = B // tb, pl.cdiv(S, ts)
    needs_seq_mask = ns * ts != S

    logit_spec = pl.BlockSpec((tb, ts, C), lambda i, j: (i, j, 0))
    sidecar_spec = pl.BlockSpec((tb, ts, 1), lambda i, j: (i, j, 0))
    in_specs = [logit_spec, sidecar_spec] + ([sidecar_spec] if has_mask else [])

    cost = pl.CostEstimate(
        flops=6 * B * S * C,
        transcendentals=B * S * C,
        bytes_accessed=(logits.size * itemsize
                        + B * S * 4 * (2 if has_mask else 1)
                        + (4 * B if reduce else 4 * B * S)),
    )
    kw = dict(pos_weight=float(pos_weight), seq_len=S, seq_tile=ts,
              needs_seq_mask=needs_seq_mask, has_mask=has_mask)

    # TODO(synk): for extreme num_classes (C*itemsize approaching the per-row
    # VMEM budget) add an inner class-chunk grid axis with an online-logsumexp
    # accumulator instead of loading the full class row per tile.

    if reduce:
        row_sums = pl.pallas_call(
            functools.partial(_ce_reduce_kernel, **kw),
            out_shape=jax.ShapeDtypeStruct((B, 1, 1), jnp.float32),
            grid=(nb, ns),
            in_specs=in_specs,
            out_specs=pl.BlockSpec((tb, 1, 1), lambda i, j: (i, 0, 0)),
            scratch_shapes=[pltpu.VMEM((tb, 1, 1), jnp.float32)],
            compiler_params=pltpu.CompilerParams(
                dimension_semantics=("parallel", "arbitrary"),
                vmem_limit_bytes=vmem_limit),
            cost_estimate=cost,
        )(*inputs)
        # mean over batch of per-row (sum over seq) losses
        return jnp.sum(row_sums) / jnp.float32(B)

    out = pl.pallas_call(
        functools.partial(_ce_noreduce_kernel, **kw),
        out_shape=jax.ShapeDtypeStruct((B, S, 1), jnp.float32),
        grid=(nb, ns),
        in_specs=in_specs,
        out_specs=pl.BlockSpec((tb, ts, 1), lambda i, j: (i, j, 0)),
        compiler_params=pltpu.CompilerParams(
            dimension_semantics=("parallel", "parallel"),
            vmem_limit_bytes=vmem_limit),
        cost_estimate=cost,
    )(*inputs)
    return out.reshape(B, S)


# ---------------------------------------------------------------------------
# pure-JAX reference (matches the PyTorch module)
# ---------------------------------------------------------------------------
def _reference(logits, target, mask, pos_weight, reduce=True):
    x = logits.astype(jnp.float32)
    logp = jax.nn.log_softmax(x, axis=-1)
    loss_mat = -jnp.take_along_axis(logp, target[..., None], axis=-1)[..., 0]
    if mask is not None:
        loss_mat = loss_mat * mask.astype(jnp.float32)
    weight = jnp.where(target > 0, pos_weight, 1.0).astype(jnp.float32)
    loss_mat = loss_mat * weight
    if reduce:
        return jnp.mean(jnp.sum(loss_mat, axis=-1))
    return loss_mat


if __name__ == "__main__":
    key = jax.random.PRNGKey(0)
    k1, k2, k3, k4, k5 = jax.random.split(key, 5)

    batch, seq_len, num_classes = 2, 8, 32
    pos_weight = 2.0

    logits = jax.random.normal(k1, (batch, seq_len, num_classes), jnp.float32)
    target = jax.random.randint(k2, (batch, seq_len), 0, num_classes, jnp.int32)
    mask = jax.random.bernoulli(k3, 0.8, (batch, seq_len)).astype(jnp.int32)

    # reduce=True (scalar) path, with mask
    loss = jax.block_until_ready(
        cross_entropy_loss(logits, target, mask, pos_weight=pos_weight, reduce=True))
    ref = _reference(logits, target, mask, pos_weight, reduce=True)
    assert jnp.allclose(loss, ref, rtol=1e-5, atol=1e-4), (loss, ref)

    # reduce=False (per-position) path
    loss_mat = jax.block_until_ready(
        cross_entropy_loss(logits, target, mask, pos_weight=pos_weight, reduce=False))
    ref_mat = _reference(logits, target, mask, pos_weight, reduce=False)
    assert loss_mat.shape == (batch, seq_len)
    assert jnp.allclose(loss_mat, ref_mat, rtol=1e-5, atol=1e-4)

    # mask=None path (compiles the variant without the mask operand)
    loss_nm = jax.block_until_ready(
        cross_entropy_loss(logits, target, None, pos_weight=pos_weight, reduce=True))
    ref_nm = _reference(logits, target, None, pos_weight, reduce=True)
    assert jnp.allclose(loss_nm, ref_nm, rtol=1e-5, atol=1e-4), (loss_nm, ref_nm)

    # non-divisible seq + forced small tile: exercises the cdiv grid, the
    # multi-step scratch accumulation and the tail-row masking path.
    b2, s2, c2 = 2, 20, 128
    logits2 = jax.random.normal(k4, (b2, s2, c2), jnp.float32)
    target2 = jax.random.randint(k5, (b2, s2), 0, c2, jnp.int32)
    loss2 = jax.block_until_ready(
        cross_entropy_loss(logits2, target2, None, pos_weight=pos_weight,
                           reduce=True, tile_override=(1, 8)))
    ref2 = _reference(logits2, target2, None, pos_weight, reduce=True)
    assert jnp.allclose(loss2, ref2, rtol=1e-5, atol=1e-4), (loss2, ref2)

    loss2_mat = jax.block_until_ready(
        cross_entropy_loss(logits2, target2, None, pos_weight=pos_weight,
                           reduce=False, tile_override=(1, 8)))
    ref2_mat = _reference(logits2, target2, None, pos_weight, reduce=False)
    assert jnp.allclose(loss2_mat, ref2_mat, rtol=1e-5, atol=1e-4)

    print("KERNEL_OK")
</pallas_src>

<mosaic_0001>
module attributes {stable_mosaic.version = 11 : i64} {
  func.func @_ce_reduce_kernel(%arg0: i32, %arg1: i32, %arg2: memref<1x8x32xf32, #tpu.memory_space<vmem>>, %arg3: memref<1x8x1xi32, #tpu.memory_space<vmem>>, %arg4: memref<1x8x1xi32, #tpu.memory_space<vmem>>, %arg5: memref<1x1x1xf32, #tpu.memory_space<vmem>>, %arg6: memref<1x1x1xf32, #tpu.memory_space<vmem>>) attributes {dimension_semantics = [#tpu.dimension_semantics<parallel>, #tpu.dimension_semantics<arbitrary>], iteration_bounds = array<i64: 2, 1>, scalar_prefetch = 0 : i64, scratch_operands = 1 : i64, tpu.core_type = #tpu.core_type<tc>, window_params = [{transform_indices = @transform_0, window_bounds = array<i64: 1, 8, 32>}, {transform_indices = @transform_1, window_bounds = array<i64: 1, 8, 1>}, {transform_indices = @transform_2, window_bounds = array<i64: 1, 8, 1>}, {transform_indices = @transform_3, window_bounds = array<i64: 1, 1, 1>}]} {
    %c0 = arith.constant 0 : index
    %c0_0 = arith.constant 0 : index
    %c0_1 = arith.constant 0 : index
    %0 = vector.load %arg2[%c0, %c0_0, %c0_1] : memref<1x8x32xf32, #tpu.memory_space<vmem>>, vector<1x8x32xf32>
    %c0_2 = arith.constant 0 : index
    %c0_3 = arith.constant 0 : index
    %c0_4 = arith.constant 0 : index
    %1 = vector.load %arg3[%c0_2, %c0_3, %c0_4] : memref<1x8x1xi32, #tpu.memory_space<vmem>>, vector<1x8x1xi32>
    %cst = arith.constant dense<0xFF800000> : vector<1x8xf32>
    %2 = vector.multi_reduction <maximumf>, %0, %cst [2] : vector<1x8x32xf32> to vector<1x8xf32>
    %3 = vector.shape_cast %2 : vector<1x8xf32> to vector<1x8x1xf32>
    %4 = vector.broadcast %3 : vector<1x8x1xf32> to vector<1x8x32xf32>
    %5 = arith.subf %0, %4 : vector<1x8x32xf32>
    %6 = math.exp %5 : vector<1x8x32xf32>
    %cst_5 = arith.constant dense<0.000000e+00> : vector<1x8xf32>
    %7 = vector.multi_reduction <add>, %6, %cst_5 [2] : vector<1x8x32xf32> to vector<1x8xf32>
    %8 = vector.shape_cast %7 : vector<1x8xf32> to vector<1x8x1xf32>
    %9 = math.log %8 : vector<1x8x1xf32>
    %10 = tpu.iota {dimensions = array<i32: 2>} : vector<1x1x32xi32>
    %11 = vector.broadcast %10 : vector<1x1x32xi32> to vector<1x8x32xi32>
    %12 = vector.broadcast %1 : vector<1x8x1xi32> to vector<1x8x32xi32>
    %13 = arith.cmpi eq, %11, %12 : vector<1x8x32xi32>
    %c0_i32 = arith.constant 0 : i32
    %14 = arith.sitofp %c0_i32 : i32 to f32
    %15 = vector.broadcast %14 : f32 to vector<1x8x32xf32>
    %16 = arith.select %13, %5, %15 : vector<1x8x32xi1>, vector<1x8x32xf32>
    %cst_6 = arith.constant dense<0.000000e+00> : vector<1x8xf32>
    %17 = vector.multi_reduction <add>, %16, %cst_6 [2] : vector<1x8x32xf32> to vector<1x8xf32>
    %18 = vector.shape_cast %17 : vector<1x8xf32> to vector<1x8x1xf32>
    %19 = arith.subf %9, %18 : vector<1x8x1xf32>
    %c0_i32_7 = arith.constant 0 : i32
    %20 = vector.broadcast %c0_i32_7 : i32 to vector<1x8x1xi32>
    %21 = arith.cmpi sgt, %1, %20 : vector<1x8x1xi32>
    %cst_8 = arith.constant 2.000000e+00 : f32
    %cst_9 = arith.constant 1.000000e+00 : f32
    %22 = vector.broadcast %cst_8 : f32 to vector<1x8x1xf32>
    %23 = vector.broadcast %cst_9 : f32 to vector<1x8x1xf32>
    %24 = arith.select %21, %22, %23 : vector<1x8x1xi1>, vector<1x8x1xf32>
    %25 = arith.mulf %19, %24 : vector<1x8x1xf32>
    %c0_10 = arith.constant 0 : index
    %c0_11 = arith.constant 0 : index
    %c0_12 = arith.constant 0 : index
    %26 = vector.load %arg4[%c0_10, %c0_11, %c0_12] : memref<1x8x1xi32, #tpu.memory_space<vmem>>, vector<1x8x1xi32>
    %27 = arith.sitofp %26 : vector<1x8x1xi32> to vector<1x8x1xf32>
    %28 = arith.mulf %25, %27 : vector<1x8x1xf32>
    %c0_i32_13 = arith.constant 0 : i32
    %29 = arith.cmpi eq, %arg1, %c0_i32_13 : i32
    %30 = arith.extui %29 : i1 to i32
    %c0_i32_14 = arith.constant 0 : i32
    %31 = arith.cmpi ne, %30, %c0_i32_14 : i32
    scf.if %31 {
      %cst_24 = arith.constant 0.000000e+00 : f32
      %40 = vector.broadcast %cst_24 : f32 to vector<1x1x1xf32>
      %c0_25 = arith.constant 0 : index
      %c0_26 = arith.constant 0 : index
      %c0_27 = arith.constant 0 : index
      %41 = vector.load %arg6[%c0_25, %c0_26, %c0_27] : memref<1x1x1xf32, #tpu.memory_space<vmem>>, vector<1x1x1xf32>
      tpu.vector_store %arg6[%c0_25, %c0_26, %c0_27], %40 {strides = array<i32>} : memref<1x1x1xf32, #tpu.memory_space<vmem>>, vector<1x1x1xf32>,
    } else {
    }
    %c0_15 = arith.constant 0 : index
    %c0_16 = arith.constant 0 : index
    %c0_17 = arith.constant 0 : index
    %32 = vector.load %arg6[%c0_15, %c0_16, %c0_17] : memref<1x1x1xf32, #tpu.memory_space<vmem>>, vector<1x1x1xf32>
    %cst_18 = arith.constant dense<0.000000e+00> : vector<1x1xf32>
    %33 = vector.multi_reduction <add>, %28, %cst_18 [1] : vector<1x8x1xf32> to vector<1x1xf32>
    %34 = vector.shape_cast %33 : vector<1x1xf32> to vector<1x1x1xf32>
    %35 = arith.addf %32, %34 : vector<1x1x1xf32>
    %c0_19 = arith.constant 0 : index
    %c0_20 = arith.constant 0 : index
    %c0_21 = arith.constant 0 : index
    %36 = vector.load %arg6[%c0_19, %c0_20, %c0_21] : memref<1x1x1xf32, #tpu.memory_space<vmem>>, vector<1x1x1xf32>
    tpu.vector_store %arg6[%c0_19, %c0_20, %c0_21], %35 {strides = array<i32>} : memref<1x1x1xf32, #tpu.memory_space<vmem>>, vector<1x1x1xf32>,
    %c0_i32_22 = arith.constant 0 : i32
    %37 = arith.cmpi eq, %arg1, %c0_i32_22 : i32
    %38 = arith.extui %37 : i1 to i32
    %c0_i32_23 = arith.constant 0 : i32
    %39 = arith.cmpi ne, %38, %c0_i32_23 : i32
    scf.if %39 {
      %c0_24 = arith.constant 0 : index
      %c0_25 = arith.constant 0 : index
      %c0_26 = arith.constant 0 : index
      %40 = vector.load %arg6[%c0_24, %c0_25, %c0_26] : memref<1x1x1xf32, #tpu.memory_space<vmem>>, vector<1x1x1xf32>
      %c0_27 = arith.constant 0 : index
      %c0_28 = arith.constant 0 : index
      %c0_29 = arith.constant 0 : index
      %41 = vector.load %arg5[%c0_27, %c0_28, %c0_29] : memref<1x1x1xf32, #tpu.memory_space<vmem>>, vector<1x1x1xf32>
      tpu.vector_store %arg5[%c0_27, %c0_28, %c0_29], %40 {strides = array<i32>} : memref<1x1x1xf32, #tpu.memory_space<vmem>>, vector<1x1x1xf32>,
    } else {
    }
    return
  }
  func.func @transform_0(%arg0: i32, %arg1: i32) -> (i32, i32, i32) {
    %c0_i32 = arith.constant 0 : i32
    %c0_i32_0 = arith.constant 0 : i32
    return %arg0, %arg1, %c0_i32 : i32, i32, i32
  }
  func.func @transform_1(%arg0: i32, %arg1: i32) -> (i32, i32, i32) {
    %c0_i32 = arith.constant 0 : i32
    %c0_i32_0 = arith.constant 0 : i32
    return %arg0, %arg1, %c0_i32 : i32, i32, i32
  }
  func.func @transform_2(%arg0: i32, %arg1: i32) -> (i32, i32, i32) {
    %c0_i32 = arith.constant 0 : i32
    %c0_i32_0 = arith.constant 0 : i32
    return %arg0, %arg1, %c0_i32 : i32, i32, i32
  }
  func.func @transform_3(%arg0: i32, %arg1: i32) -> (i32, i32, i32) {
    %c0_i32 = arith.constant 0 : i32
    %c0_i32_0 = arith.constant 0 : i32
    %c0_i32_1 = arith.constant 0 : i32
    return %arg0, %c0_i32, %c0_i32_0 : i32, i32, i32
  }
}

</mosaic_0001>

<bundles_post_ra>
// kernel: tpu_custom_call.1
= control target key start
LH: loop header
LB: loop body
LE: loop exit
PB: predicated region body
PF: predicated region fallthrough
CT: control target
= control target key end

     0   :  { %s474_s12 = smov 0   ;;  %s476_s13 = smov 0   ;;  %s528_s0 = inlined_call_operand.vmem [shape: f32[2,8,32], index: 0, kind: input, shape index: {}]   ;;  %s529_s1 = inlined_call_operand.vmem [shape: s32[2,8,1], index: 1, kind: input, shape index: {}]   ;;  %s530_s2 = inlined_call_operand.vmem [shape: s32[2,8,1], index: 2, kind: input, shape index: {}]   ;;  %s531_s3 = inlined_call_operand.vmem [shape: f32[2,1,1], index: 3, kind: output, shape index: {}]  }
   0x1   :  { %s478_s14 = smov 0  }
   0x2 LB: > { %s25_s15 = sadd.s32 1, %s445_s13  ;;  %p389_p0 = scmp.ge.s32.totalorder %s449_s14, 1  ;;  %s449_s14 = sphi %s478_s14, %s13_s14   ;;  %s445_s13 = sphi %s476_s13, %s533_s13   ;;  %s441_s12 = sphi %s474_s12, %s532_s12  }
   0x3   : > { %p27_p1 = scmp.ge.s32.totalorder %s25_s15, 2  ;;  %p181_p2 = scmp.lt.s32.totalorder %s449_s14, 3 }
   0x5   : > { %s535_s15 = smov (%p27_p1, %s25_s15), 0  ;;  %p182_p3 = pnand %p389_p0, %p181_p2 }
   0x6   : > { %p219_p4 = scmp.lt.s32.totalorder (!%p182_p3), %s441_s12, 1  ;;  %v451_v0 = vmov (!%p182_p3), 0   ;;  %vm245_vm0 = vcmask (!%p182_p3), 261120   ;;  %v257_v7 = vlaneseq (!%p182_p3)  ;;  %vm278_vm2 = vcmask (!%p182_p3), 0  }
   0x7   : > { %185 = sbr.rel (%p182_p3) target bundleno = 362 (0x16a), region = 32  ;;  %422 = vset.pattern.permute.xlu0 (!%p182_p3), %v451_v0  ;;  %v452_v14 = vmov (!%p182_p3), 0.0   ;;  %v453_v19 = vmov (!%p182_p3), 1.0   ;;  %vm281_vm4 = vcmask (!%p182_p3), 7168  }
   0x8   : > { %v258_v8 = vand.u32 (!%p182_p3), 127, %v257_v7  ;;  %279 = vst.msk [vmem:[#allocation2] sm:$0x1] (!%p182_p3), %vm278_vm2, %v452_v14 }
   0xe   : > { %s537_s12 = smov (!%p219_p4, %s441_s12), 1 }
   0xf   : > { %s495_s16 = sshll.u32 %s537_s12, 3  ;;  %v280_v32 = vld [vmem:[#allocation2] sm:$0x1]  ;;  %s242_s28 = scalar_lea.vmem %s531_s3, %s537_s12 }
  0x10   : > { %s225_s19 = scalar_lea.vmem %s528_s0, %s495_s16  ;;  %s232_s22 = scalar_lea.vmem %s529_s1, %s495_s16 }
  0x11   : > { %v243_v1 = vld [vmem:[%s225_s19] sm:$0xff]  ;;  %s239_s25 = scalar_lea.vmem %s530_s2, %s495_s16 }
  0x12   : > { %v246_v2 = vsel %vm245_vm0, %v243_v1, -inf  ;;  %v244_v3 = vld [vmem:[%s232_s22] sm:$0xff] }
  0x13   : > { %247 = vmax.xlane.f32.xlu0 %v246_v2  ;;  %vm268_vm3 = vcmp.gt.s32.totalorder %v244_v3, 0  ;;  %v271_v17 = vld [vmem:[%s239_s25] sm:$0xff] }
  0x14   : > { %v269_v20 = vsel %vm268_vm3, 2.0, %v453_v19  ;;  %v272_v22 = vcvt.s32.f32 %v271_v17 }
  0x29   : > { %260 = vperm.xlu0 %422, %v244_v3  }
  0xa0   : > { %v248_v4 = vpop.xlane.xlu0 %247 }
  0xa1   : > { %v249_v5 = vsub.f32 %v243_v1, %v248_v4 }
  0xa3   : > { %v250_v6 = vmul.f32 1.442695, %v249_v5 }
  0xa5   : > { %423 = vpow2.f32 %v250_v6 }
  0xa8   : > { %v261_v9 = vpop.permute.xlu0 %260 }
  0xa9   : > { %vm262_vm1 = vcmp.eq.s32.totalorder %v258_v8, %v261_v9 }
  0xaa   : > { %v263_v12 = vsel %vm262_vm1, %v249_v5, 0.0 }
  0xab   : > { %v264_v13 = vsel %vm245_vm0, %v263_v12, 0.0 }
  0xaf   : > { %v424_v10 = vpop.eup %423 }
  0xb0   : > { %v252_v11 = vsel %vm245_vm0, %v424_v10, 0.0 }
  0xb1   : > { %253 = vadd.xlane.f32.xlu1 %v252_v11 }
  0xb5   : > { %265 = vadd.xlane.f32.xlu1 %v264_v13 }
 0x13e   : > { %v254_v15 = vpop.xlane.xlu1 %253 }
 0x13f   : > { %425 = vlog2.f32 %v254_v15 }
 0x142   : > { %v266_v21 = vpop.xlane.xlu1 %265 }
 0x149   : > { %v426_v16 = vpop.eup %425 }
 0x14a   : > { %v256_v18 = vmul.f32 0.6931472, %v426_v16 }
 0x14c   : > { %v267_v23 = vsub.f32 %v256_v18, %v266_v21 }
 0x14e   : > { %v270_v24 = vmul.f32 %v269_v20, %v267_v23 }
 0x150   : > { %v273_v25 = vmul.f32 %v272_v22, %v270_v24 }
 0x152   : > { %v282_v26 = vsel %vm281_vm4, %v273_v25, 0.0 }
 0x153   : > { %v283_v27 = vrot.slane %v282_v26, 4 }
 0x155   : > { %v284_v28 = vadd.f32 %v283_v27, %v282_v26 }
 0x157   : > { %v285_v29 = vrot.slane %v284_v28, 2 }
 0x159   : > { %v286_v30 = vadd.f32 %v285_v29, %v284_v28 }
 0x15b   : > { %v287_v31 = vrot.slane %v286_v30, 1 }
 0x15d   : > { %v288_v33 = vadd.f32 %v287_v31, %v286_v30 }
 0x15f   : > { %v289_v34 = vadd.f32 %v288_v33, %v280_v32 }
 0x161   : > { %291 = vst.msk [vmem:[#allocation2] sm:$0x1] %vm278_vm2, %v289_v34 }
 0x168   : > { %v295_v35 = vld [vmem:[#allocation2] sm:$0x1] }
 0x169   : > { %296 = vst.msk [vmem:[%s242_s28] sm:$0x1] %vm278_vm2, %v295_v35 }
 0x16a PF: > { %s13_s14 = sadd.s32 1, %s449_s14   ;;  %s532_s12 = smov %s445_s13 }
 0x16b   : > { %p10_p5 = scmp.ge.s32.totalorder %s13_s14, 4   ;;  %s533_s13 = smov %s535_s15 }
 0x16d   :  { %12 = sbr.rel (!%p10_p5) target bundleno = 2 (0x2), region = 76 }

</bundles_post_ra>
